<compile_context>
chip_gen: v6e
topology: v6e:2x2x1
jax: 0.10.0
libtpu: 0.0.40
codegen_flags: <defaults>
</compile_context>

<pallas_src>
import jax
import jax.numpy as jnp
from jax.experimental import pallas as pl
from jax.experimental.pallas import tpu as pltpu

_LANES = 128
_SUBLANES = 8
_ONE_SIXTH = 1.0 / 6.0

# Per-tensor byte size above which we switch from the fused single-block path
# to the tiled, pipelined per-tensor path.
_SMALL_BYTES = 2 * 1024 * 1024
# Row tile for the large-tensor path: (2048, 128) f32 == 1 MiB per block
# (double-buffered in + out stays far below the 32 MiB scoped VMEM limit).
_TILE_ROWS = 2048


# ---------------- math helpers (f32 compute) ---------------------------------

def _scale_hardswish(t):
    """hardswish(2*t - 1) with the input affine folded in."""
    t = t.astype(jnp.float32)
    u = t + t                               # 2*t (exact)
    v = u - 1.0                             # hardswish argument
    c = jnp.clip(u + 2.0, 0.0, 6.0)         # == clip(v + 3, 0, 6)
    return v * c * _ONE_SIXTH               # multiply by 1/6, never divide


def _hardswish(v):
    return v * jnp.clip(v + 3.0, 0.0, 6.0) * _ONE_SIXTH


# ---------------- fused small-tensor kernel: one launch, 4 in / 4 out --------

def _fused_kernel(x_ref, y_ref, z_ref, w_ref, xo_ref, yo_ref, zo_ref, wo_ref):
    xo_ref[...] = _scale_hardswish(x_ref[...]).astype(xo_ref.dtype)
    yo_ref[...] = _scale_hardswish(y_ref[...]).astype(yo_ref.dtype)
    zo_ref[...] = _scale_hardswish(z_ref[...]).astype(zo_ref.dtype)
    wo_ref[...] = _hardswish(_scale_hardswish(w_ref[...])).astype(wo_ref.dtype)


# ---------------- tiled per-tensor kernels for large inputs ------------------

def _once_kernel(x_ref, o_ref):
    o_ref[...] = _scale_hardswish(x_ref[...]).astype(o_ref.dtype)


def _twice_kernel(x_ref, o_ref):
    o_ref[...] = _hardswish(_scale_hardswish(x_ref[...])).astype(o_ref.dtype)


# ---------------- slab helpers ------------------------------------------------

def _to_slab(t, row_multiple=_SUBLANES):
    """Flatten to a lane-dense (rows, 128) slab; rows a multiple of row_multiple."""
    flat = t.reshape(-1)
    n = flat.shape[0]
    chunk = _LANES * row_multiple
    padded = -(-n // chunk) * chunk
    if padded != n:
        flat = jnp.pad(flat, (0, padded - n))
    return flat.reshape(-1, _LANES), n


def _from_slab(slab, n, shape, dtype):
    return slab.reshape(-1)[:n].reshape(shape).astype(dtype)


# ---------------- fused path (all tensors small) ------------------------------

def _fused_forward(x, y, z, w):
    slabs, metas = [], []
    for t in (x, y, z, w):
        slab, n = _to_slab(t)
        slabs.append(slab)
        metas.append((n, t.shape, t.dtype))
    outs = pl.pallas_call(
        _fused_kernel,
        out_shape=tuple(jax.ShapeDtypeStruct(s.shape, s.dtype) for s in slabs),
        in_specs=[pl.BlockSpec(memory_space=pltpu.VMEM)] * 4,
        out_specs=tuple(pl.BlockSpec(memory_space=pltpu.VMEM) for _ in range(4)),
        input_output_aliases={0: 0, 1: 1, 2: 2, 3: 3},
    )(*slabs)
    return tuple(_from_slab(o, *m) for o, m in zip(outs, metas))


# ---------------- tiled path (any tensor large) --------------------------------

def _run_tiled(t, twice):
    # Pad once, directly to a multiple of the full tile (rows multiple of 2048).
    slab, n = _to_slab(t, row_multiple=_TILE_ROWS)
    rows = slab.shape[0]
    kernel = _twice_kernel if twice else _once_kernel
    out = pl.pallas_call(
        kernel,
        out_shape=jax.ShapeDtypeStruct(slab.shape, slab.dtype),
        grid=(rows // _TILE_ROWS,),
        in_specs=[pl.BlockSpec((_TILE_ROWS, _LANES), lambda i: (i, 0))],
        out_specs=pl.BlockSpec((_TILE_ROWS, _LANES), lambda i: (i, 0)),
        compiler_params=pltpu.CompilerParams(
            dimension_semantics=("parallel",),        # shards across v7x's 2 TCs
            vmem_limit_bytes=32 * 1024 * 1024,
        ),
        input_output_aliases={0: 0},
    )(slab)
    return _from_slab(out, n, t.shape, t.dtype)


# ---------------- public forward ----------------------------------------------

@jax.jit
def model_forward(x, y, z, w):
    """Mirrors Model.forward: returns (x, y, z, w) after scale + hardswish
    (hardswish applied twice to w)."""
    tensors = (x, y, z, w)
    if all(t.size * t.dtype.itemsize <= _SMALL_BYTES for t in tensors):
        return _fused_forward(x, y, z, w)
    return tuple(_run_tiled(t, twice=(i == 3)) for i, t in enumerate(tensors))


# ---------------- reference ----------------------------------------------------

def _reference_forward(x, y, z, w):
    def hsw(v):
        return v * jnp.clip(v + 3.0, 0.0, 6.0) / 6.0

    x = hsw(x * 2 - 1)
    y = hsw(y * 2 - 1)
    z = hsw(z * 2 - 1)
    w = hsw(hsw(w * 2 - 1))
    return x, y, z, w


if __name__ == "__main__":
    key = jax.random.PRNGKey(0)
    kx, ky, kz, kw, kb = jax.random.split(key, 5)
    # Small shapes consistent with the pnnx test (rank 2/3/4/5 inputs).
    x = jax.random.uniform(kx, (2, 16), dtype=jnp.float32, minval=-2.0, maxval=2.0)
    y = jax.random.uniform(ky, (2, 8, 16), dtype=jnp.float32, minval=-2.0, maxval=2.0)
    z = jax.random.uniform(kz, (2, 4, 8, 16), dtype=jnp.float32, minval=-2.0, maxval=2.0)
    w = jax.random.uniform(kw, (2, 3, 4, 8, 16), dtype=jnp.float32, minval=-2.0, maxval=2.0)

    outs = jax.block_until_ready(model_forward(x, y, z, w))
    refs = _reference_forward(x, y, z, w)
    for o, r in zip(outs, refs):
        assert o.shape == r.shape and o.dtype == r.dtype
        assert jnp.allclose(o, r, atol=1e-5), "fused path mismatch vs reference"

    # Also exercise the tiled large-tensor path (grid + pipelined blocks).
    big = jax.random.uniform(kb, (64, 3, 128, 128), dtype=jnp.float32,
                             minval=-2.0, maxval=2.0)      # 12 MiB -> tiled path
    tiled_fn = jax.jit(lambda t: _run_tiled(t, twice=True))
    big_out = jax.block_until_ready(tiled_fn(big))
    big_ref = _reference_forward(big, big, big, big)[3]
    assert jnp.allclose(big_out, big_ref, atol=1e-5), "tiled path mismatch vs reference"

    print("KERNEL_OK")
</pallas_src>

<mosaic_0001>
module attributes {stable_mosaic.version = 11 : i64} {
  func.func @_fused_kernel(%arg0: memref<8x128xf32, #tpu.memory_space<vmem>>, %arg1: memref<8x128xf32, #tpu.memory_space<vmem>>, %arg2: memref<8x128xf32, #tpu.memory_space<vmem>>, %arg3: memref<24x128xf32, #tpu.memory_space<vmem>>, %arg4: memref<8x128xf32, #tpu.memory_space<vmem>>, %arg5: memref<8x128xf32, #tpu.memory_space<vmem>>, %arg6: memref<8x128xf32, #tpu.memory_space<vmem>>, %arg7: memref<24x128xf32, #tpu.memory_space<vmem>>) attributes {dimension_semantics = [], scalar_prefetch = 0 : i64, scratch_operands = 0 : i64, tpu.core_type = #tpu.core_type<tc>} {
    %c0 = arith.constant 0 : index
    %c0_0 = arith.constant 0 : index
    %0 = vector.load %arg0[%c0, %c0_0] : memref<8x128xf32, #tpu.memory_space<vmem>>, vector<8x128xf32>
    %1 = arith.addf %0, %0 : vector<8x128xf32>
    %cst = arith.constant 1.000000e+00 : f32
    %2 = vector.broadcast %cst : f32 to vector<8x128xf32>
    %3 = arith.subf %1, %2 : vector<8x128xf32>
    %cst_1 = arith.constant 2.000000e+00 : f32
    %4 = vector.broadcast %cst_1 : f32 to vector<8x128xf32>
    %5 = arith.addf %1, %4 : vector<8x128xf32>
    %cst_2 = arith.constant 0.000000e+00 : f32
    %cst_3 = arith.constant 6.000000e+00 : f32
    %6 = vector.broadcast %cst_2 : f32 to vector<8x128xf32>
    %7 = arith.maximumf %6, %5 : vector<8x128xf32>
    %8 = vector.broadcast %cst_3 : f32 to vector<8x128xf32>
    %9 = arith.minimumf %8, %7 : vector<8x128xf32>
    %10 = arith.mulf %3, %9 : vector<8x128xf32>
    %cst_4 = arith.constant 0.166666672 : f32
    %11 = vector.broadcast %cst_4 : f32 to vector<8x128xf32>
    %12 = arith.mulf %10, %11 : vector<8x128xf32>
    %c0_5 = arith.constant 0 : index
    %c0_6 = arith.constant 0 : index
    %13 = vector.load %arg4[%c0_5, %c0_6] : memref<8x128xf32, #tpu.memory_space<vmem>>, vector<8x128xf32>
    tpu.vector_store %arg4[%c0_5, %c0_6], %12 {strides = array<i32>} : memref<8x128xf32, #tpu.memory_space<vmem>>, vector<8x128xf32>,
    %c0_7 = arith.constant 0 : index
    %c0_8 = arith.constant 0 : index
    %14 = vector.load %arg1[%c0_7, %c0_8] : memref<8x128xf32, #tpu.memory_space<vmem>>, vector<8x128xf32>
    %15 = arith.addf %14, %14 : vector<8x128xf32>
    %cst_9 = arith.constant 1.000000e+00 : f32
    %16 = vector.broadcast %cst_9 : f32 to vector<8x128xf32>
    %17 = arith.subf %15, %16 : vector<8x128xf32>
    %cst_10 = arith.constant 2.000000e+00 : f32
    %18 = vector.broadcast %cst_10 : f32 to vector<8x128xf32>
    %19 = arith.addf %15, %18 : vector<8x128xf32>
    %cst_11 = arith.constant 0.000000e+00 : f32
    %cst_12 = arith.constant 6.000000e+00 : f32
    %20 = vector.broadcast %cst_11 : f32 to vector<8x128xf32>
    %21 = arith.maximumf %20, %19 : vector<8x128xf32>
    %22 = vector.broadcast %cst_12 : f32 to vector<8x128xf32>
    %23 = arith.minimumf %22, %21 : vector<8x128xf32>
    %24 = arith.mulf %17, %23 : vector<8x128xf32>
    %cst_13 = arith.constant 0.166666672 : f32
    %25 = vector.broadcast %cst_13 : f32 to vector<8x128xf32>
    %26 = arith.mulf %24, %25 : vector<8x128xf32>
    %c0_14 = arith.constant 0 : index
    %c0_15 = arith.constant 0 : index
    %27 = vector.load %arg5[%c0_14, %c0_15] : memref<8x128xf32, #tpu.memory_space<vmem>>, vector<8x128xf32>
    tpu.vector_store %arg5[%c0_14, %c0_15], %26 {strides = array<i32>} : memref<8x128xf32, #tpu.memory_space<vmem>>, vector<8x128xf32>,
    %c0_16 = arith.constant 0 : index
    %c0_17 = arith.constant 0 : index
    %28 = vector.load %arg2[%c0_16, %c0_17] : memref<8x128xf32, #tpu.memory_space<vmem>>, vector<8x128xf32>
    %29 = arith.addf %28, %28 : vector<8x128xf32>
    %cst_18 = arith.constant 1.000000e+00 : f32
    %30 = vector.broadcast %cst_18 : f32 to vector<8x128xf32>
    %31 = arith.subf %29, %30 : vector<8x128xf32>
    %cst_19 = arith.constant 2.000000e+00 : f32
    %32 = vector.broadcast %cst_19 : f32 to vector<8x128xf32>
    %33 = arith.addf %29, %32 : vector<8x128xf32>
    %cst_20 = arith.constant 0.000000e+00 : f32
    %cst_21 = arith.constant 6.000000e+00 : f32
    %34 = vector.broadcast %cst_20 : f32 to vector<8x128xf32>
    %35 = arith.maximumf %34, %33 : vector<8x128xf32>
    %36 = vector.broadcast %cst_21 : f32 to vector<8x128xf32>
    %37 = arith.minimumf %36, %35 : vector<8x128xf32>
    %38 = arith.mulf %31, %37 : vector<8x128xf32>
    %cst_22 = arith.constant 0.166666672 : f32
    %39 = vector.broadcast %cst_22 : f32 to vector<8x128xf32>
    %40 = arith.mulf %38, %39 : vector<8x128xf32>
    %c0_23 = arith.constant 0 : index
    %c0_24 = arith.constant 0 : index
    %41 = vector.load %arg6[%c0_23, %c0_24] : memref<8x128xf32, #tpu.memory_space<vmem>>, vector<8x128xf32>
    tpu.vector_store %arg6[%c0_23, %c0_24], %40 {strides = array<i32>} : memref<8x128xf32, #tpu.memory_space<vmem>>, vector<8x128xf32>,
    %c0_25 = arith.constant 0 : index
    %c0_26 = arith.constant 0 : index
    %42 = vector.load %arg3[%c0_25, %c0_26] : memref<24x128xf32, #tpu.memory_space<vmem>>, vector<24x128xf32>
    %43 = arith.addf %42, %42 : vector<24x128xf32>
    %cst_27 = arith.constant 1.000000e+00 : f32
    %44 = vector.broadcast %cst_27 : f32 to vector<24x128xf32>
    %45 = arith.subf %43, %44 : vector<24x128xf32>
    %cst_28 = arith.constant 2.000000e+00 : f32
    %46 = vector.broadcast %cst_28 : f32 to vector<24x128xf32>
    %47 = arith.addf %43, %46 : vector<24x128xf32>
    %cst_29 = arith.constant 0.000000e+00 : f32
    %cst_30 = arith.constant 6.000000e+00 : f32
    %48 = vector.broadcast %cst_29 : f32 to vector<24x128xf32>
    %49 = arith.maximumf %48, %47 : vector<24x128xf32>
    %50 = vector.broadcast %cst_30 : f32 to vector<24x128xf32>
    %51 = arith.minimumf %50, %49 : vector<24x128xf32>
    %52 = arith.mulf %45, %51 : vector<24x128xf32>
    %cst_31 = arith.constant 0.166666672 : f32
    %53 = vector.broadcast %cst_31 : f32 to vector<24x128xf32>
    %54 = arith.mulf %52, %53 : vector<24x128xf32>
    %cst_32 = arith.constant 3.000000e+00 : f32
    %55 = vector.broadcast %cst_32 : f32 to vector<24x128xf32>
    %56 = arith.addf %54, %55 : vector<24x128xf32>
    %cst_33 = arith.constant 0.000000e+00 : f32
    %cst_34 = arith.constant 6.000000e+00 : f32
    %57 = vector.broadcast %cst_33 : f32 to vector<24x128xf32>
    %58 = arith.maximumf %57, %56 : vector<24x128xf32>
    %59 = vector.broadcast %cst_34 : f32 to vector<24x128xf32>
    %60 = arith.minimumf %59, %58 : vector<24x128xf32>
    %61 = arith.mulf %54, %60 : vector<24x128xf32>
    %cst_35 = arith.constant 0.166666672 : f32
    %62 = vector.broadcast %cst_35 : f32 to vector<24x128xf32>
    %63 = arith.mulf %61, %62 : vector<24x128xf32>
    %c0_36 = arith.constant 0 : index
    %c0_37 = arith.constant 0 : index
    %64 = vector.load %arg7[%c0_36, %c0_37] : memref<24x128xf32, #tpu.memory_space<vmem>>, vector<24x128xf32>
    tpu.vector_store %arg7[%c0_36, %c0_37], %63 {strides = array<i32>} : memref<24x128xf32, #tpu.memory_space<vmem>>, vector<24x128xf32>,
    return
  }
}

</mosaic_0001>

<bundles_post_ra>
// kernel: model_forward.1
= control target key start
LH: loop header
LB: loop body
LE: loop exit
PB: predicated region body
PF: predicated region fallthrough
CT: control target
= control target key end

     0   :  { %s188_s0 = inlined_call_operand.vmem [shape: f32[8,128], index: 0, kind: input, shape index: {}, may-alias: {0,4}]   ;;  %s189_s1 = inlined_call_operand.vmem [shape: f32[8,128], index: 1, kind: input, shape index: {}, may-alias: {1,5}]   ;;  %s190_s2 = inlined_call_operand.vmem [shape: f32[8,128], index: 2, kind: input, shape index: {}, may-alias: {2,6}]   ;;  %s191_s3 = inlined_call_operand.vmem [shape: f32[24,128], index: 3, kind: input, shape index: {}, may-alias: {3,7}]   ;;  %s192_s4 = inlined_call_operand.vmem [shape: f32[8,128], index: 4, kind: output, shape index: {0}, may-alias: {0,4}]   ;;  %s193_s5 = inlined_call_operand.vmem [shape: f32[8,128], index: 5, kind: output, shape index: {1}, may-alias: {1,5}]   ;;  %s194_s6 = inlined_call_operand.vmem [shape: f32[8,128], index: 6, kind: output, shape index: {2}, may-alias: {2,6}]   ;;  %s195_s7 = inlined_call_operand.vmem [shape: f32[24,128], index: 7, kind: output, shape index: {3}, may-alias: {3,7}]  }
   0x1   :  { %v21_v0 = vld [vmem:[%s188_s0] sm:$0xff]  ;;  %v49_v7 = vld [vmem:[%s191_s3 + $0x8] sm:$0xff]  ;;  %v50_v8 = vld [vmem:[%s191_s3 + $0x10] sm:$0xff] }
   0x2   :  { %v30_v1 = vld [vmem:[%s189_s1] sm:$0xff]  ;;  %v22_v3 = vadd.f32 %v21_v0, %v21_v0  ;;  %v52_v10 = vadd.f32 %v49_v7, %v49_v7  ;;  %v53_v11 = vadd.f32 %v50_v8, %v50_v8 }
   0x3   :  { %v39_v2 = vld [vmem:[%s190_s2] sm:$0xff]  ;;  %v31_v4 = vadd.f32 %v30_v1, %v30_v1 }
   0x4   :  { %v40_v5 = vadd.f32 %v39_v2, %v39_v2  ;;  %v48_v6 = vld [vmem:[%s191_s3] sm:$0xff]  ;;  %v24_v12 = vadd.f32 2.0, %v22_v3  ;;  %v106_v14 = vadd.f32 -1.0, %v22_v3  ;;  %v58_v21 = vadd.f32 2.0, %v52_v10 }
   0x5   :  { %v51_v9 = vadd.f32 %v48_v6, %v48_v6  ;;  %v33_v13 = vadd.f32 2.0, %v31_v4  ;;  %v107_v15 = vadd.f32 -1.0, %v31_v4  ;;  %v59_v25 = vadd.f32 2.0, %v53_v11 }
   0x6   :  { %v42_v16 = vadd.f32 2.0, %v40_v5  ;;  %v25_v18 = vmax.f32 %v24_v12, 0.0  ;;  %v108_v20 = vadd.f32 -1.0, %v40_v5  ;;  %v110_v28 = vadd.f32 -1.0, %v52_v10 }
   0x7   :  { %v57_v17 = vadd.f32 2.0, %v51_v9  ;;  %v34_v19 = vmax.f32 %v33_v13, 0.0  ;;  %v109_v23 = vadd.f32 -1.0, %v51_v9  ;;  %v61_v29 = vmax.f32 %v58_v21, 0.0 }
   0x8   :  { %v43_v22 = vmax.f32 %v42_v16, 0.0  ;;  %v26_v26 = vmin.f32 %v25_v18, 6.0  ;;  %v111_v32 = vadd.f32 -1.0, %v53_v11  ;;  %v62_v33 = vmax.f32 %v59_v25, 0.0 }
   0x9   :  { %v60_v24 = vmax.f32 %v57_v17, 0.0  ;;  %v35_v27 = vmin.f32 %v34_v19, 6.0  ;;  %v64_v36 = vmin.f32 %v61_v29, 6.0 }
   0xa   :  { %v44_v30 = vmin.f32 %v43_v22, 6.0  ;;  %v27_v34 = vmul.f32 %v106_v14, %v26_v26  ;;  %v65_v39 = vmin.f32 %v62_v33, 6.0 }
   0xb   :  { %v63_v31 = vmin.f32 %v60_v24, 6.0  ;;  %v36_v35 = vmul.f32 %v107_v15, %v35_v27  ;;  %v67_v42 = vmul.f32 %v110_v28, %v64_v36 }
   0xc   :  { %v45_v37 = vmul.f32 %v108_v20, %v44_v30  ;;  %v28_v40 = vmul.f32 0.16666667, %v27_v34  ;;  %v68_v45 = vmul.f32 %v111_v32, %v65_v39 }
   0xd   :  { %v66_v38 = vmul.f32 %v109_v23, %v63_v31  ;;  %v37_v41 = vmul.f32 0.16666667, %v36_v35  ;;  %v70_v46 = vmul.f32 0.16666667, %v67_v42 }
   0xe   :  { %v46_v43 = vmul.f32 0.16666667, %v45_v37  ;;  %29 = vst [vmem:[%s192_s4] sm:$0xff] %v28_v40  ;;  %v71_v48 = vmul.f32 0.16666667, %v68_v45 }
   0xf   :  { %v69_v44 = vmul.f32 0.16666667, %v66_v38  ;;  %38 = vst [vmem:[%s193_s5] sm:$0xff] %v37_v41  ;;  %v73_v49 = vadd.f32 3.0, %v70_v46 }
  0x10   :  { %47 = vst [vmem:[%s194_s6] sm:$0xff] %v46_v43  ;;  %v74_v51 = vadd.f32 3.0, %v71_v48 }
  0x11   :  { %v72_v47 = vadd.f32 3.0, %v69_v44  ;;  %v76_v52 = vmax.f32 %v73_v49, 0.0 }
  0x12   :  { %v77_v54 = vmax.f32 %v74_v51, 0.0 }
  0x13   :  { %v75_v50 = vmax.f32 %v72_v47, 0.0  ;;  %v79_v55 = vmin.f32 %v76_v52, 6.0 }
  0x14   :  { %v80_v57 = vmin.f32 %v77_v54, 6.0 }
  0x15   :  { %v78_v53 = vmin.f32 %v75_v50, 6.0  ;;  %v82_v58 = vmul.f32 %v79_v55, %v70_v46 }
  0x16   :  { %v83_v60 = vmul.f32 %v80_v57, %v71_v48 }
  0x17   :  { %v81_v56 = vmul.f32 %v78_v53, %v69_v44  ;;  %v85_v61 = vmul.f32 0.16666667, %v82_v58 }
  0x18   :  { %v86_v62 = vmul.f32 0.16666667, %v83_v60 }
  0x19   :  { %v84_v59 = vmul.f32 0.16666667, %v81_v56  ;;  %88 = vst [vmem:[%s195_s7 + $0x8] sm:$0xff] %v85_v61 }
  0x1a   :  { %89 = vst [vmem:[%s195_s7 + $0x10] sm:$0xff] %v86_v62 }
  0x1b   :  { %87 = vst [vmem:[%s195_s7] sm:$0xff] %v84_v59 }

</bundles_post_ra>
